<compile_context>
chip_gen: v5e
topology: v5e:2x2
jax: 0.10.0
libtpu: 0.0.40
codegen_flags: <defaults>
</compile_context>

<pallas_src>
import functools

import jax
import jax.numpy as jnp
from jax.experimental import pallas as pl
from jax.experimental.pallas import tpu as pltpu


DIM1 = 64   # hid_feats
DIM2 = 32   # out_feats / per-block feature width


# ------------------------------ Pallas kernels ------------------------------

def _relu(x):
    return jnp.maximum(x, 0.0)


def _dot(x, w):
    return jnp.dot(x, w, preferred_element_type=jnp.float32)


def _mlp2_kernel(x_ref, w0_ref, b0_ref, w1_ref, b1_ref, o_ref):
    """out = relu(relu(x@w0+b0) @ w1 + b1)  -- MEGNetBlock node dense layers."""
    h = _relu(_dot(x_ref[...], w0_ref[...]) + b0_ref[...])
    o_ref[...] = _relu(_dot(h, w1_ref[...]) + b1_ref[...])


def _edge_block_kernel(ef_ref, xs_ref, xd_ref,
                       edw0_ref, edb0_ref, edw1_ref, edb1_ref,
                       wvs_ref, wvr_ref, wek_ref, b0_ref,
                       w1_ref, b1_ref, w2_ref, b2_ref,
                       eout_ref, eres_ref, *, residual_from_input):
    """Fused per-edge pipeline:
         he   = relu(relu(efeat@Wd0+bd0)@Wd1+bd1)          (edge dense layers)
         h    = relu(xs@Wvsk + xd@Wvrk + he@Wek + b)       (u_add_v + ek, layer 0)
         h    = relu(h@W1+b1) ;  e = relu(h@W2+b2)         (EdgeUpdate layers 1,2)
         eout = e ;  eres = e + (efeat | he)               (MEGNetBlock residual)
    """
    he = _relu(_dot(ef_ref[...], edw0_ref[...]) + edb0_ref[...])
    he = _relu(_dot(he, edw1_ref[...]) + edb1_ref[...])
    h = _relu(_dot(xs_ref[...], wvs_ref[...])
              + _dot(xd_ref[...], wvr_ref[...])
              + _dot(he, wek_ref[...])
              + b0_ref[...])
    h = _relu(_dot(h, w1_ref[...]) + b1_ref[...])
    e = _relu(_dot(h, w2_ref[...]) + b2_ref[...])
    eout_ref[...] = e
    # block 0: residual = dense-layer output he; later blocks: residual = raw edge
    # input (width DIM2).  The choice is static (baked in per pallas_call).
    eres_ref[...] = e + (ef_ref[...] if residual_from_input else he)


def _node_block_kernel(x_ref, agg_ref, res_ref,
                       wvi_ref, wvie_ref, b0_ref,
                       w1_ref, b1_ref, w2_ref, b2_ref, o_ref):
    """Fused NodeUpdate MLP + block residual add."""
    h = _relu(_dot(x_ref[...], wvi_ref[...])
              + _dot(agg_ref[...], wvie_ref[...])
              + b0_ref[...])
    h = _relu(_dot(h, w1_ref[...]) + b1_ref[...])
    v = _relu(_dot(h, w2_ref[...]) + b2_ref[...])
    o_ref[...] = v + res_ref[...]


# ------------------------- generic row-tiled launcher ------------------------

def _round_up(x, m):
    return ((x + m - 1) // m) * m


def _pad_rows(x, padded_rows):
    if x.shape[0] == padded_rows:
        return x
    return jnp.pad(x, ((0, padded_rows - x.shape[0]), (0, 0)))


def _row_tiled_call(kernel, row_inputs, const_inputs, out_widths, block_rows=512):
    """Launch `kernel` tiled over rows.  Row tensors are zero-padded to a multiple of
    the tile (tails masked by slicing the outputs); weights/biases are passed whole."""
    rows = row_inputs[0].shape[0]
    block = min(block_rows, _round_up(rows, 8))     # big tiles, 8-sublane aligned
    padded = _round_up(rows, block)
    row_inputs = [_pad_rows(x, padded) for x in row_inputs]

    in_specs = (
        [pl.BlockSpec((block, x.shape[1]), lambda i: (i, 0)) for x in row_inputs]
        + [pl.BlockSpec(w.shape, lambda i: (0, 0)) for w in const_inputs]
    )
    out_specs = [pl.BlockSpec((block, w), lambda i: (i, 0)) for w in out_widths]
    out_shape = [jax.ShapeDtypeStruct((padded, w), jnp.float32) for w in out_widths]
    single = len(out_widths) == 1

    outs = pl.pallas_call(
        kernel,
        grid=(padded // block,),
        in_specs=in_specs,
        out_specs=out_specs[0] if single else out_specs,
        out_shape=out_shape[0] if single else out_shape,
        compiler_params=pltpu.CompilerParams(dimension_semantics=("parallel",)),
    )(*row_inputs, *const_inputs)

    if single:
        outs = (outs,)
    return tuple(o[:rows] for o in outs)


# ------------------------------- parameters ---------------------------------

def _xavier_normal(key, fan_in, fan_out, gain):
    std = gain * jnp.sqrt(2.0 / (fan_in + fan_out))
    # PyTorch Linear.weight is (out,in); store transposed (in,out) so kernels do x@W.
    return jax.random.normal(key, (fan_in, fan_out), dtype=jnp.float32) * std


def init_megnet_params(key, in_feats, in_efeats, megnet_num=2, dim1=DIM1, dim2=DIM2):
    gain = jnp.sqrt(2.0)                     # nn.init.calculate_gain('relu')
    blocks = []
    bkeys = jax.random.split(key, megnet_num)
    for n in range(megnet_num):
        node_in = in_feats if n == 0 else dim2
        edge_in = in_efeats if n == 0 else dim2
        k = jax.random.split(bkeys[n], 26)

        def bias(i, width):
            return jax.random.normal(k[13 + i], (1, width), jnp.float32) * 0.05

        blk = {
            # MEGNetBlock dense layers (dense_layer_num=2)
            "nd_w0": _xavier_normal(k[0], node_in, dim1, gain), "nd_b0": bias(0, dim1),
            "nd_w1": _xavier_normal(k[1], dim1, dim2, gain),    "nd_b1": bias(1, dim2),
            "ed_w0": _xavier_normal(k[2], edge_in, dim1, gain), "ed_b0": bias(2, dim1),
            "ed_w1": _xavier_normal(k[3], dim1, dim2, gain),    "ed_b1": bias(3, dim2),
            # EdgeUpdate (mlp_layer=3)
            "eu_vsk_w": _xavier_normal(k[4], dim2, dim1, gain), "eu_vsk_b": bias(4, dim1),
            "eu_vrk_w": _xavier_normal(k[5], dim2, dim1, gain), "eu_vrk_b": bias(5, dim1),
            "eu_ek_w":  _xavier_normal(k[6], dim2, dim1, gain), "eu_ek_b":  bias(6, dim1),
            "eu_w1": _xavier_normal(k[7], dim1, dim1, gain),    "eu_b1": bias(7, dim1),
            "eu_w2": _xavier_normal(k[8], dim1, dim2, gain),    "eu_b2": bias(8, dim2),
            # NodeUpdate (mlp_layer=3, mean aggregation)
            "nu_vi_w":  _xavier_normal(k[9], dim2, dim1, gain),  "nu_vi_b":  bias(9, dim1),
            "nu_vie_w": _xavier_normal(k[10], dim2, dim1, gain), "nu_vie_b": bias(10, dim1),
            "nu_w1": _xavier_normal(k[11], dim1, dim1, gain),    "nu_b1": bias(11, dim1),
            "nu_w2": _xavier_normal(k[12], dim1, dim2, gain),    "nu_b2": bias(12, dim2),
        }
        blocks.append(blk)
    return {"blocks": blocks}


# ------------------------------ forward passes -------------------------------

def _segment_mean(data, segment_ids, num_segments):
    # TODO(synk): edge->node mean aggregation (DGL update_all copy_e+mean) stays in plain
    # JAX (XLA scatter); an in-kernel version needs sorted edges + scalar-prefetch offsets.
    total = jax.ops.segment_sum(data, segment_ids, num_segments=num_segments)
    count = jax.ops.segment_sum(jnp.ones((data.shape[0], 1), data.dtype),
                                segment_ids, num_segments=num_segments)
    return total / jnp.maximum(count, 1.0)


def megnet_forward(params, feat, efeat, src_idx, dst_idx, block_rows=512):
    """Pallas equivalent of MEGNet.forward(graph, feat, efeat)."""
    num_nodes = feat.shape[0]
    vout, eout = feat, efeat
    for n, bp in enumerate(params["blocks"]):
        feat_in, efeat_in = vout, eout

        # node dense layers (fused 2-layer MLP): (N,*) -> (N,64) -> (N,32)
        (hx,) = _row_tiled_call(
            _mlp2_kernel, [feat_in],
            [bp["nd_w0"], bp["nd_b0"], bp["nd_w1"], bp["nd_b1"]],
            (DIM2,), block_rows)

        # TODO(synk): u_add_v row gather done with jnp.take on the raw 32-wide dense node
        # features (no 64-wide projected intermediates are materialized in HBM anymore).
        xs = jnp.take(hx, src_idx, axis=0)
        xd = jnp.take(hx, dst_idx, axis=0)

        # fused edge pipeline: edge dense layers + EdgeUpdate MLP + block residual
        b0 = bp["eu_vsk_b"] + bp["eu_vrk_b"] + bp["eu_ek_b"]
        eout_pre, eout_res = _row_tiled_call(
            functools.partial(_edge_block_kernel, residual_from_input=(n != 0)),
            [efeat_in, xs, xd],
            [bp["ed_w0"], bp["ed_b0"], bp["ed_w1"], bp["ed_b1"],
             bp["eu_vsk_w"], bp["eu_vrk_w"], bp["eu_ek_w"], b0,
             bp["eu_w1"], bp["eu_b1"], bp["eu_w2"], bp["eu_b2"]],
            (DIM2, DIM2), block_rows)

        # NodeUpdate: mean-aggregate the (pre-residual) edge output onto dst nodes
        agg = _segment_mean(eout_pre, dst_idx, num_nodes)
        nres = hx if n == 0 else feat_in
        nb0 = bp["nu_vi_b"] + bp["nu_vie_b"]
        (vout_res,) = _row_tiled_call(
            _node_block_kernel, [hx, agg, nres],
            [bp["nu_vi_w"], bp["nu_vie_w"], nb0,
             bp["nu_w1"], bp["nu_b1"], bp["nu_w2"], bp["nu_b2"]],
            (DIM2,), block_rows)

        vout, eout = vout_res, eout_res
    return vout, eout


def megnet_reference(params, feat, efeat, src_idx, dst_idx):
    """Pure-JAX reference mirroring the PyTorch/DGL forward exactly."""
    relu = lambda x: jnp.maximum(x, 0.0)
    num_nodes = feat.shape[0]
    vout, eout = feat, efeat
    for n, bp in enumerate(params["blocks"]):
        feat_in, efeat_in = vout, eout
        hx = relu(feat_in @ bp["nd_w0"] + bp["nd_b0"])
        hx = relu(hx @ bp["nd_w1"] + bp["nd_b1"])
        he = relu(efeat_in @ bp["ed_w0"] + bp["ed_b0"])
        he = relu(he @ bp["ed_w1"] + bp["ed_b1"])
        vsk = hx @ bp["eu_vsk_w"] + bp["eu_vsk_b"]
        vrk = hx @ bp["eu_vrk_w"] + bp["eu_vrk_b"]
        ek = he @ bp["eu_ek_w"] + bp["eu_ek_b"]
        e = relu(vsk[src_idx] + vrk[dst_idx] + ek)
        e = relu(e @ bp["eu_w1"] + bp["eu_b1"])
        e = relu(e @ bp["eu_w2"] + bp["eu_b2"])
        vi = hx @ bp["nu_vi_w"] + bp["nu_vi_b"]
        agg = _segment_mean(e, dst_idx, num_nodes)
        vie = agg @ bp["nu_vie_w"] + bp["nu_vie_b"]
        v = relu(vi + vie)
        v = relu(v @ bp["nu_w1"] + bp["nu_b1"])
        v = relu(v @ bp["nu_w2"] + bp["nu_b2"])
        if n == 0:
            eout, vout = e + he, v + hx
        else:
            eout, vout = e + efeat_in, v + feat_in
    return vout, eout


if __name__ == "__main__":
    in_feats, in_efeats = 16, 12
    num_nodes, num_edges = 24, 50      # deliberately not multiples of the tile size

    key = jax.random.PRNGKey(0)
    kp, kf, ke, ks, kd = jax.random.split(key, 5)
    params = init_megnet_params(kp, in_feats, in_efeats, megnet_num=2)

    feat = jax.random.normal(kf, (num_nodes, in_feats), dtype=jnp.float32)
    efeat = jax.random.normal(ke, (num_edges, in_efeats), dtype=jnp.float32)
    src_idx = jax.random.randint(ks, (num_edges,), 0, num_nodes)
    dst_idx = jax.random.randint(kd, (num_edges,), 0, num_nodes)

    vout, eout = megnet_forward(params, feat, efeat, src_idx, dst_idx)
    vout, eout = jax.block_until_ready((vout, eout))

    vref, eref = megnet_reference(params, feat, efeat, src_idx, dst_idx)
    assert vout.shape == (num_nodes, DIM2) and eout.shape == (num_edges, DIM2)
    assert jnp.allclose(vout, vref, atol=5e-3, rtol=5e-3)
    assert jnp.allclose(eout, eref, atol=5e-3, rtol=5e-3)

    print("KERNEL_OK")
</pallas_src>

<mosaic_0001>
module attributes {stable_mosaic.version = 11 : i64} {
  func.func @_mlp2_kernel(%arg0: i32, %arg1: memref<24x16xf32, #tpu.memory_space<vmem>>, %arg2: memref<16x64xf32, #tpu.memory_space<vmem>>, %arg3: memref<1x64xf32, #tpu.memory_space<vmem>>, %arg4: memref<64x32xf32, #tpu.memory_space<vmem>>, %arg5: memref<1x32xf32, #tpu.memory_space<vmem>>, %arg6: memref<24x32xf32, #tpu.memory_space<vmem>>) attributes {dimension_semantics = [#tpu.dimension_semantics<parallel>], iteration_bounds = array<i64: 1>, scalar_prefetch = 0 : i64, scratch_operands = 0 : i64, tpu.core_type = #tpu.core_type<tc>, window_params = [{transform_indices = @transform_0, window_bounds = array<i64: 24, 16>}, {pipeline_mode = #tpu.pipeline_mode<synchronous>, transform_indices = @transform_1, window_bounds = array<i64: 16, 64>}, {pipeline_mode = #tpu.pipeline_mode<synchronous>, transform_indices = @transform_2, window_bounds = array<i64: 1, 64>}, {pipeline_mode = #tpu.pipeline_mode<synchronous>, transform_indices = @transform_3, window_bounds = array<i64: 64, 32>}, {pipeline_mode = #tpu.pipeline_mode<synchronous>, transform_indices = @transform_4, window_bounds = array<i64: 1, 32>}, {transform_indices = @transform_5, window_bounds = array<i64: 24, 32>}]} {
    %c0 = arith.constant 0 : index
    %c0_0 = arith.constant 0 : index
    %0 = vector.load %arg1[%c0, %c0_0] : memref<24x16xf32, #tpu.memory_space<vmem>>, vector<24x16xf32>
    %c0_1 = arith.constant 0 : index
    %c0_2 = arith.constant 0 : index
    %1 = vector.load %arg2[%c0_1, %c0_2] : memref<16x64xf32, #tpu.memory_space<vmem>>, vector<16x64xf32>
    %cst = arith.constant dense<0.000000e+00> : vector<24x64xf32>
    %2 = tpu.matmul %0, %1, %cst {dimension_numbers = #tpu.dot_dimension_numbers<[1], [0], [0], [1], [0, 0, 1, 1], [], []>} : vector<24x16xf32>, vector<16x64xf32>, vector<24x64xf32> -> vector<24x64xf32>
    %c0_3 = arith.constant 0 : index
    %c0_4 = arith.constant 0 : index
    %3 = vector.load %arg3[%c0_3, %c0_4] : memref<1x64xf32, #tpu.memory_space<vmem>>, vector<1x64xf32>
    %4 = vector.broadcast %3 : vector<1x64xf32> to vector<24x64xf32>
    %5 = arith.addf %2, %4 : vector<24x64xf32>
    %cst_5 = arith.constant 0.000000e+00 : f32
    %6 = vector.broadcast %cst_5 : f32 to vector<24x64xf32>
    %7 = arith.maximumf %5, %6 : vector<24x64xf32>
    %c0_6 = arith.constant 0 : index
    %c0_7 = arith.constant 0 : index
    %8 = vector.load %arg4[%c0_6, %c0_7] : memref<64x32xf32, #tpu.memory_space<vmem>>, vector<64x32xf32>
    %cst_8 = arith.constant dense<0.000000e+00> : vector<24x32xf32>
    %9 = tpu.matmul %7, %8, %cst_8 {dimension_numbers = #tpu.dot_dimension_numbers<[1], [0], [0], [1], [0, 0, 1, 1], [], []>} : vector<24x64xf32>, vector<64x32xf32>, vector<24x32xf32> -> vector<24x32xf32>
    %c0_9 = arith.constant 0 : index
    %c0_10 = arith.constant 0 : index
    %10 = vector.load %arg5[%c0_9, %c0_10] : memref<1x32xf32, #tpu.memory_space<vmem>>, vector<1x32xf32>
    %11 = vector.broadcast %10 : vector<1x32xf32> to vector<24x32xf32>
    %12 = arith.addf %9, %11 : vector<24x32xf32>
    %cst_11 = arith.constant 0.000000e+00 : f32
    %13 = vector.broadcast %cst_11 : f32 to vector<24x32xf32>
    %14 = arith.maximumf %12, %13 : vector<24x32xf32>
    %c0_12 = arith.constant 0 : index
    %c0_13 = arith.constant 0 : index
    %15 = vector.load %arg6[%c0_12, %c0_13] : memref<24x32xf32, #tpu.memory_space<vmem>>, vector<24x32xf32>
    tpu.vector_store %arg6[%c0_12, %c0_13], %14 {strides = array<i32>} : memref<24x32xf32, #tpu.memory_space<vmem>>, vector<24x32xf32>,
    return
  }
  func.func @transform_0(%arg0: i32) -> (i32, i32) {
    %c0_i32 = arith.constant 0 : i32
    %c0_i32_0 = arith.constant 0 : i32
    return %arg0, %c0_i32 : i32, i32
  }
  func.func @transform_1(%arg0: i32) -> (i32, i32) {
    %c0_i32 = arith.constant 0 : i32
    %c0_i32_0 = arith.constant 0 : i32
    %c0_i32_1 = arith.constant 0 : i32
    return %c0_i32, %c0_i32_0 : i32, i32
  }
  func.func @transform_2(%arg0: i32) -> (i32, i32) {
    %c0_i32 = arith.constant 0 : i32
    %c0_i32_0 = arith.constant 0 : i32
    %c0_i32_1 = arith.constant 0 : i32
    return %c0_i32, %c0_i32_0 : i32, i32
  }
  func.func @transform_3(%arg0: i32) -> (i32, i32) {
    %c0_i32 = arith.constant 0 : i32
    %c0_i32_0 = arith.constant 0 : i32
    %c0_i32_1 = arith.constant 0 : i32
    return %c0_i32, %c0_i32_0 : i32, i32
  }
  func.func @transform_4(%arg0: i32) -> (i32, i32) {
    %c0_i32 = arith.constant 0 : i32
    %c0_i32_0 = arith.constant 0 : i32
    %c0_i32_1 = arith.constant 0 : i32
    return %c0_i32, %c0_i32_0 : i32, i32
  }
  func.func @transform_5(%arg0: i32) -> (i32, i32) {
    %c0_i32 = arith.constant 0 : i32
    %c0_i32_0 = arith.constant 0 : i32
    return %arg0, %c0_i32 : i32, i32
  }
}

</mosaic_0001>

<bundles_post_ra>
// kernel: tpu_custom_call.1
= control target key start
LH: loop header
LB: loop body
LE: loop exit
PB: predicated region body
PF: predicated region fallthrough
CT: control target
= control target key end

     0   :  { %vm30_vm0 = vcmask 130048   ;;  %s279_s0 = inlined_call_operand.vmem [shape: f32[24,16], index: 0, kind: input, shape index: {}]   ;;  %s280_s1 = inlined_call_operand.vmem [shape: f32[16,64], index: 1, kind: input, shape index: {}]   ;;  %s281_s2 = inlined_call_operand.vmem [shape: f32[1,64], index: 2, kind: input, shape index: {}]   ;;  %s282_s3 = inlined_call_operand.vmem [shape: f32[64,32], index: 3, kind: input, shape index: {}]   ;;  %s283_s4 = inlined_call_operand.vmem [shape: f32[1,32], index: 4, kind: input, shape index: {}]   ;;  %s284_s5 = inlined_call_operand.hbm [shape: f32[24,32], index: 5, kind: output, shape index: {}]  }
   0x1   :  { %v25_v0 = vld [vmem:[%s280_s1 + $0x8] sm:$0xff]  ;;  %v24_v1 = vld [vmem:[%s280_s1] sm:$0xff]  ;;  %v76_v3 = vld [vmem:[%s282_s3 + $0x38] sm:$0xff] }
   0x2   :  { %54 = vmatpush.msra.mxu0 %v25_v0  ;;  %v21_v2 = vld [vmem:[%s279_s0] sm:$0xff]  ;;  %99 = vmatpush.msra.mxu1 %v76_v3  ;;  %v75_v4 = vld [vmem:[%s282_s3 + $0x30] sm:$0xff]  ;;  %v74_v5 = vld [vmem:[%s282_s3 + $0x28] sm:$0xff] }
   0x3   :  { %148 = vmatpush.msra.mxu2 %v76_v3  ;;  %149 = vmatpush.msra.mxu3 %v76_v3 }
   0x4   :  { %55 = vmatpush.msra.mxu0 %v24_v1  ;;  %100 = vmatpush.msra.mxu1 %v75_v4 }
   0x5   :  { %142 = vmatmul.msk.f32.vlgmr.msra.gmra.mxu0 %vm30_vm0, %v21_v2 }
   0x6   :  { %10 = vsyncpa [#allocation3], 0  ;;  %v73_v6 = vld [vmem:[%s282_s3 + $0x20] sm:$0xff]  ;;  %150 = vmatpush.msra.mxu2 %v75_v4  ;;  %151 = vmatpush.msra.mxu3 %v75_v4  ;;  %v72_v7 = vld [vmem:[%s282_s3 + $0x18] sm:$0xff]  ;;  %vm81_vm1 = vcmask 523264   ;;  %vm120_vm2 = vcmask 261120  }
   0x7   :  { %101 = vmatpush.msra.mxu1 %v74_v5  ;;  %v22_v8 = vld [vmem:[%s279_s0 + $0x8] sm:$0xff]  ;;  %v23_v9 = vld [vmem:[%s279_s0 + $0x10] sm:$0xff]  ;;  %v69_v12 = vld [vmem:[%s282_s3] sm:$0xff]  ;;  %s130_s23 = sshll.u32 %s284_s5, 4  ;;  %s197_s24 = smov 8   ;;  %s131_s23 = int_to_ptr.hbm [resolvable:$true] %s130_s23 }
   0x8   :  { %152 = vmatpush.msra.mxu2 %v74_v5  ;;  %153 = vmatpush.msra.mxu3 %v74_v5  ;;  %v71_v10 = vld [vmem:[%s282_s3 + $0x10] sm:$0xff]  ;;  %v70_v11 = vld [vmem:[%s282_s3 + $0x8] sm:$0xff]  ;;  %v167_v13 = vld [vmem:[%s281_s2] ss:$0 sm:$0xff]  ;;  %s195_s2 = smov [#allocation2]  }
   0x9   :  { %102 = vmatpush.msra.mxu1 %v73_v6  ;;  %v168_v23 = vld [vmem:[%s283_s4] ss:$0 sm:$0xff]  ;;  %s128_s20 = sshll.u32 %s195_s2, 4  ;;  %s196_s4 = smov 128   ;;  %s129_s20 = int_to_ptr.vmem [resolvable:$true] %s128_s20 }
   0xa   :  { %154 = vmatpush.msra.mxu2 %v73_v6  ;;  %155 = vmatpush.msra.mxu3 %v73_v6 }
   0xb   :  { %103 = vmatpush.msra.mxu1 %v72_v7 }
   0xc   :  { %156 = vmatpush.msra.mxu2 %v72_v7  ;;  %157 = vmatpush.msra.mxu3 %v72_v7 }
   0xd   :  { %143 = vmatmul.msk.f32.gmra.mxu0 %vm30_vm0, %v22_v8  ;;  %104 = vmatpush.msra.mxu1 %v71_v10 }
   0xe   :  { %158 = vmatpush.msra.mxu2 %v71_v10  ;;  %159 = vmatpush.msra.mxu3 %v71_v10 }
   0xf   :  { %105 = vmatpush.msra.mxu1 %v70_v11 }
  0x10   :  { %160 = vmatpush.msra.mxu2 %v70_v11  ;;  %161 = vmatpush.msra.mxu3 %v70_v11 }
  0x11   :  { %106 = vmatpush.msra.mxu1 %v69_v12 }
  0x12   :  { %162 = vmatpush.msra.mxu2 %v69_v12  ;;  %163 = vmatpush.msra.mxu3 %v69_v12 }
  0x15   :  { %144 = vmatmul.msk.f32.gmra.mxu0 %vm30_vm0, %v23_v9 }
  0x82   :  { %v57_v14 = vpop.f32.mrf.mxu0 }
  0x83   :  { %v58_v15 = vadd.f32 %v167_v13, %v57_v14 }
  0x85   :  { %v66_v16 = vmax.f32 %v58_v15, 0.0 }
  0x87   :  { %145 = vmatmul.msk.f32.vlgmr.msra.gmra.mxu1 %vm81_vm1, %v66_v16 }
  0x8a   :  { %v60_v17 = vpop.f32.mrf.mxu0 }
  0x8b   :  { %v61_v18 = vadd.f32 %v167_v13, %v60_v17 }
  0x8d   :  { %v67_v19 = vmax.f32 %v61_v18, 0.0 }
  0x8f   :  { %146 = vmatmul.msk.f32.vlgmr.msra.gmra.mxu2 %vm81_vm1, %v67_v19 }
  0x92   :  { %v63_v20 = vpop.f32.mrf.mxu0 }
  0x93   :  { %v64_v21 = vadd.f32 %v167_v13, %v63_v20 }
  0x95   :  { %v68_v22 = vmax.f32 %v64_v21, 0.0 }
  0x97   :  { %147 = vmatmul.msk.f32.vlgmr.msra.gmra.mxu3 %vm81_vm1, %v68_v22 }
 0x104   :  { %v108_v24 = vpop.f32.mrf.mxu1 }
 0x105   :  { %v109_v25 = vadd.f32 %v168_v23, %v108_v24 }
 0x107   :  { %v117_v26 = vmax.f32 %v109_v25, 0.0 }
 0x109   :  { %121 = vst.msk [vmem:[#allocation2] sm:$0xff] %vm120_vm2, %v117_v26 }
 0x112   :  { %v111_v27 = vpop.f32.mrf.mxu2 }
 0x113   :  { %v112_v28 = vadd.f32 %v168_v23, %v111_v27 }
 0x115   :  { %v118_v29 = vmax.f32 %v112_v28, 0.0 }
 0x117   :  { %122 = vst.msk [vmem:[#allocation2 + $0x8] sm:$0xff] %vm120_vm2, %v118_v29 }
 0x11a   :  { %v114_v30 = vpop.f32.mrf.mxu3 }
 0x11b   :  { %v115_v31 = vadd.f32 %v168_v23, %v114_v30 }
 0x11d   :  { %v119_v32 = vmax.f32 %v115_v31, 0.0 }
 0x11f   :  { %123 = vst.msk [vmem:[#allocation2 + $0x10] sm:$0xff] %vm120_vm2, %v119_v32 }
 0x120   :  { %136 = dma.vmem_to_hbm [thread:$0]  %s129_s20, 384, %s131_s23, [#allocation3], %s196_s4, %s196_s4, %s197_s24  }
 0x121   :  { %193 = dma.done.wait [#allocation3], 384  }
 0x122   :  { %194 = vsyncadd [#allocation3], 4294966912 }
 0x123   :  { %141 = vsyncpa [#allocation3], 1 }

</bundles_post_ra>
